<compile_context>
chip_gen: v5e
topology: v5e:2x2
jax: 0.10.0
libtpu: 0.0.40
codegen_flags: <defaults>
</compile_context>

<pallas_src>
import functools

import jax
import jax.numpy as jnp
from jax import lax
from jax.experimental import pallas as pl
from jax.experimental.pallas import tpu as pltpu


# ----------------------------------------------------------------------------
# Fused kernel: LSTM recurrence + row selection + fused Predictor0/1/Propensity
# ----------------------------------------------------------------------------
def _fused_kernel(
    idx_ref,                    # (tot, 1) int32  stacked [t0_idx; t1_idx]
    x_ref,                      # (T*N, F) bf16   time-major flattened pretime
    wih_ref,                    # (F, 4H)  bf16   W_ih^T
    whhp_ref,                   # (4H, 4H) bf16   W_hh^T zero-padded to 4H rows
    b_ref,                      # (1, 4H)  f32    b_ih + b_hh
    w1_ref,                     # (4H, W1) bf16   [p0_w1 | p1_w1 | pr_w1 | 0], rows H: zero
    b1_ref,                     # (1, W1)  f32    [p0_b1 | p1_b1 | pr_b1 | 0]
    hmask_ref,                  # (tot, W1) f32   row-half mask for the fused hidden
    w2_ref,                     # (W1, OUT_W) bf16 block-diag -> [pred | logit0 logit1 | 0]
    b2_ref,                     # (tot, OUT_W) f32 per-row layer-2 bias slab
    o_ref,                      # (tot, OUT_W) f32 output slab [pred | prob0 prob1 | 0]
    *, N, T, H):
    f32 = jnp.float32
    bf16 = jnp.bfloat16
    G = whhp_ref.shape[0]       # 4H
    tot = o_ref.shape[0]

    # ---- hoisted input projection: one MXU push for all timesteps ----
    xp = jnp.dot(x_ref[...], wih_ref[...], preferred_element_type=f32) + b_ref[...]
    whh = whhp_ref[...]                                   # (G, G) bf16, rows H: are zero

    # ---- hoisted lane mask (no broadcast CSE inside the loop) ----
    lane = lax.broadcasted_iota(jnp.int32, (N, G), 1)
    g_lane = (lane >= 2 * H) & (lane < 3 * H)             # tanh-gate lanes

    # ---- LSTM recurrence, fully unrolled (static T); state kept 4H wide ----
    # Lanes 0:H of h/c are the true state; lanes H:4H hold bounded garbage that is
    # annihilated by the zero rows of whhp / w1 (finite * 0 == 0).
    h = jnp.zeros((N, G), f32)
    c = jnp.zeros((N, G), f32)
    for t in range(T):
        gates = xp[t * N:(t + 1) * N, :] + jnp.dot(
            h.astype(bf16), whh, preferred_element_type=f32)      # (N, 4H), order i,f,g,o
        # two full-vreg EUP pushes + one select instead of four sub-vreg activations
        act = jnp.where(g_lane, jnp.tanh(gates), jax.nn.sigmoid(gates))
        i_g = act                                                 # i already at lanes 0:H
        f_g = pltpu.roll(act, shift=3 * H, axis=1)                # f -> lanes 0:H (XLU)
        g_g = pltpu.roll(act, shift=2 * H, axis=1)                # g -> lanes 0:H
        o_g = pltpu.roll(act, shift=1 * H, axis=1)                # o -> lanes 0:H
        c = f_g * c + i_g * g_g
        h = o_g * jnp.tanh(c)

    # ---- emb[t0_idx] / emb[t1_idx]: one broadcast compare + one MXU gather ----
    col = lax.broadcasted_iota(jnp.int32, (tot, N), 1)
    sel = jnp.where(col == idx_ref[...], 1.0, 0.0).astype(bf16)   # (tot, N) one-hot
    emb = jnp.dot(sel, h.astype(bf16), preferred_element_type=f32)  # (tot, 4H); lanes 0:H valid

    # ---- fused heads, layer 1: single lane-dense push over [p0_w1 | p1_w1 | pr_w1] ----
    h1 = jnp.maximum(
        jnp.dot(emb.astype(bf16), w1_ref[...], preferred_element_type=f32) + b1_ref[...], 0.0)
    h1 = h1 * hmask_ref[...]                               # row-half select (precomputed mask)

    # ---- fused heads, layer 2: block-diagonal push emits the whole output slab ----
    slab = jnp.dot(h1.astype(bf16), w2_ref[...], preferred_element_type=f32) + b2_ref[...]
    # slab lanes: 0 = pred (p0 for rows < B0, p1 otherwise), 1:3 = propensity logits, rest 0

    # ---- in-place masked softmax over logit lanes 1:3 (pred lane untouched) ----
    lane_o = lax.broadcasted_iota(jnp.int32, slab.shape, 1)
    pmask = (lane_o >= 1) & (lane_o < 3)
    m = jnp.max(slab, axis=-1, keepdims=True)              # any per-row shift is valid & stable
    e = jnp.exp(slab - m)
    s = jnp.sum(jnp.where(pmask, e, 0.0), axis=-1, keepdims=True)
    o_ref[...] = jnp.where(pmask, e / s, slab)


# ----------------------------------------------------------------------------
# Wrapper
# ----------------------------------------------------------------------------
def my_model_forward(params, pretime, t0_idx, t1_idx):
    N, T, F = pretime.shape
    H = params["w_hh_t"].shape[0]
    B0, B1 = int(t0_idx.shape[0]), int(t1_idx.shape[0])
    tot = B0 + B1
    G = 4 * H
    W1 = ((3 * H + 127) // 128) * 128      # fused head hidden width (lane-dense)
    OUT_W = 128                            # lane-dense output slab width
    f32, bf16 = jnp.float32, jnp.bfloat16

    # time-major flattened input: row t*N + n holds series n at time t, so the hoisted
    # input projection yields contiguous (and sublane-aligned) per-timestep row blocks.
    x2d = jnp.transpose(pretime, (1, 0, 2)).reshape(T * N, F).astype(bf16)

    b2d = params["b_lstm"].reshape(1, G).astype(f32)
    whh_pad = jnp.zeros((G, G), f32).at[:H, :].set(params["w_hh_t"]).astype(bf16)

    # --- fused head weights (would be precomputed once per checkpoint in production) ---
    w1cat = jnp.zeros((G, W1), f32)
    w1cat = w1cat.at[:H, 0:H].set(params["p0_w1"])
    w1cat = w1cat.at[:H, H:2 * H].set(params["p1_w1"])
    w1cat = w1cat.at[:H, 2 * H:3 * H].set(params["pr_w1"])
    w1cat = w1cat.astype(bf16)
    b1cat = jnp.zeros((1, W1), f32)
    b1cat = b1cat.at[:, 0:H].set(params["p0_b1"][None, :])
    b1cat = b1cat.at[:, H:2 * H].set(params["p1_b1"][None, :])
    b1cat = b1cat.at[:, 2 * H:3 * H].set(params["pr_b1"][None, :])

    # row-half mask: p0 lanes live for rows < B0, p1 lanes for rows >= B0, pr lanes for all
    rows = jnp.arange(tot)[:, None]
    lanes = jnp.arange(W1)[None, :]
    hmask = jnp.where(lanes < H, rows < B0,
                      jnp.where(lanes < 2 * H, rows >= B0, lanes < 3 * H)).astype(f32)

    # block-diagonal layer-2 weight: col 0 = pred, cols 1:3 = propensity logits
    w2cat = jnp.zeros((W1, OUT_W), f32)
    w2cat = w2cat.at[0:H, 0:1].set(params["p0_w2"])
    w2cat = w2cat.at[H:2 * H, 0:1].set(params["p1_w2"])
    w2cat = w2cat.at[2 * H:3 * H, 1:3].set(params["pr_w2"])
    w2cat = w2cat.astype(bf16)
    b2slab = jnp.zeros((tot, OUT_W), f32)
    b2slab = b2slab.at[:, 1:3].set(params["pr_b2"][None, :])
    b2slab = b2slab.at[:, 0].set(jnp.where(jnp.arange(tot) < B0,
                                           params["p0_b2"][0], params["p1_b2"][0]))

    idx = jnp.concatenate([t0_idx, t1_idx]).astype(jnp.int32).reshape(tot, 1)

    kernel = functools.partial(_fused_kernel, N=N, T=T, H=H)

    def full(shape):
        return pl.BlockSpec(shape, lambda *_: (0,) * len(shape))

    out = pl.pallas_call(
        kernel,
        out_shape=jax.ShapeDtypeStruct((tot, OUT_W), f32),
        grid_spec=pltpu.PrefetchScalarGridSpec(
            num_scalar_prefetch=0,
            grid=(1,),
            in_specs=[
                full((tot, 1)),
                full((T * N, F)),
                full((F, G)),
                full((G, G)),
                full((1, G)),
                full((G, W1)),
                full((1, W1)),
                full((tot, W1)),
                full((W1, OUT_W)),
                full((tot, OUT_W)),
            ],
            out_specs=full((tot, OUT_W)),
        ),
        compiler_params=pltpu.CompilerParams(dimension_semantics=("arbitrary",)),
    )(idx, x2d, params["w_ih_t"].astype(bf16), whh_pad, b2d,
      w1cat, b1cat, hmask, w2cat, b2slab)

    preds0 = out[:B0, 0:1]
    preds1 = out[B0:, 0:1]
    pred_pro0 = out[:B0, 1:3]
    pred_pro1 = out[B0:, 1:3]
    return preds0, preds1, pred_pro0, pred_pro1


# ----------------------------------------------------------------------------
# Parameter init (b_lstm == b_ih + b_hh of PyTorch's nn.LSTM)
# ----------------------------------------------------------------------------
def init_params(key, feat_dim, hidden_dim):
    H, F = hidden_dim, feat_dim
    ks = jax.random.split(key, 12)
    s = 0.1

    def lin(kw, kb, din, dout):
        return (s * jax.random.normal(kw, (din, dout), jnp.float32),
                s * jax.random.normal(kb, (dout,), jnp.float32))

    params = {
        "w_ih_t": s * jax.random.normal(ks[0], (F, 4 * H), jnp.float32),
        "w_hh_t": s * jax.random.normal(ks[1], (H, 4 * H), jnp.float32),
        "b_lstm": s * jax.random.normal(ks[2], (4 * H,), jnp.float32),
    }
    params["p0_w1"], params["p0_b1"] = lin(ks[3], ks[4], H, H)
    params["p0_w2"], params["p0_b2"] = lin(ks[5], ks[6], H, 1)
    params["p1_w1"], params["p1_b1"] = lin(ks[7], ks[8], H, H)
    params["p1_w2"], params["p1_b2"] = lin(ks[9], ks[10], H, 1)
    kpa, kpb, kpc, kpd = jax.random.split(ks[11], 4)
    params["pr_w1"], params["pr_b1"] = lin(kpa, kpb, H, H)
    params["pr_w2"], params["pr_b2"] = lin(kpc, kpd, H, 2)
    return params


# ----------------------------------------------------------------------------
# Pure-JAX reference. mxu_dtype=bf16 reproduces the kernel's MXU-operand rounding
# (tight structural check); mxu_dtype=f32 is the exact PyTorch-equivalent forward
# (bounds the bf16 drift).
# ----------------------------------------------------------------------------
def ref_forward(params, pretime, t0_idx, t1_idx, mxu_dtype=jnp.float32):
    N, T, F = pretime.shape
    H = params["w_hh_t"].shape[0]
    f32 = jnp.float32

    def mm(a, b):
        return jnp.dot(a.astype(mxu_dtype), b.astype(mxu_dtype),
                       preferred_element_type=f32)

    def rnd(x):
        return x.astype(mxu_dtype).astype(f32)

    h = jnp.zeros((N, H), f32)
    c = jnp.zeros((N, H), f32)
    for t in range(T):
        gates = (mm(pretime[:, t, :], params["w_ih_t"]) + params["b_lstm"]
                 + mm(h, params["w_hh_t"]))
        i_g = jax.nn.sigmoid(gates[:, :H]); f_g = jax.nn.sigmoid(gates[:, H:2 * H])
        g_g = jnp.tanh(gates[:, 2 * H:3 * H]); o_g = jax.nn.sigmoid(gates[:, 3 * H:])
        c = f_g * c + i_g * g_g
        h = o_g * jnp.tanh(c)

    emb = rnd(h)                      # the kernel's one-hot MXU gather selects bf16(h) rows
    emb0, emb1 = emb[t0_idx], emb[t1_idx]

    def mlp(x, w1, b1, w2, b2):
        hh = jnp.maximum(mm(x, w1) + b1, 0.0)
        return mm(hh, w2) + b2

    preds0 = mlp(emb0, params["p0_w1"], params["p0_b1"], params["p0_w2"], params["p0_b2"])
    preds1 = mlp(emb1, params["p1_w1"], params["p1_b1"], params["p1_w2"], params["p1_b2"])
    pro0 = jax.nn.softmax(
        mlp(emb0, params["pr_w1"], params["pr_b1"], params["pr_w2"], params["pr_b2"]), axis=-1)
    pro1 = jax.nn.softmax(
        mlp(emb1, params["pr_w1"], params["pr_b1"], params["pr_w2"], params["pr_b2"]), axis=-1)
    return preds0, preds1, pro0, pro1


if __name__ == "__main__":
    N, T, F, H = 8, 8, 4, 32     # series, time steps, input features, Hidden

    key = jax.random.PRNGKey(0)
    k_par, k_x = jax.random.split(key)
    params = init_params(k_par, F, H)

    pretime = jax.random.normal(k_x, (N, T, F), jnp.float32)
    t0_idx = jnp.array([0, 1, 2, 3], dtype=jnp.int32)
    t1_idx = jnp.array([4, 5, 6, 7], dtype=jnp.int32)

    fwd = jax.jit(my_model_forward)
    outs = jax.block_until_ready(fwd(params, pretime, t0_idx, t1_idx))
    preds0, preds1, pred_pro0, pred_pro1 = outs

    assert preds0.shape == (4, 1) and preds1.shape == (4, 1)
    assert pred_pro0.shape == (4, 2) and pred_pro1.shape == (4, 2)

    # (a) structural check vs a reference with MATCHING bf16 MXU-operand rounding:
    #     only f32 summation-order / transcendental-implementation differences remain
    #     (<~1e-4 over the 8-step recurrence), so 1e-3 catches any gate-order/bias/mask bug.
    refs_bf16 = ref_forward(params, pretime, t0_idx, t1_idx, mxu_dtype=jnp.bfloat16)
    for got, want in zip(outs, refs_bf16):
        err = float(jnp.max(jnp.abs(got - want)))
        assert err < 1e-3, ("structural mismatch vs bf16-matched reference", err)

    # (b) drift bound vs the exact f32 forward: bf16 MXU operands through the 8-step
    #     recurrence + heads stay well under 2e-2 at these weight/input scales.
    refs_f32 = ref_forward(params, pretime, t0_idx, t1_idx, mxu_dtype=jnp.float32)
    for got, want in zip(outs, refs_f32):
        err = float(jnp.max(jnp.abs(got - want)))
        assert err < 2e-2, ("bf16 MXU drift vs f32 reference too large", err)

    print("KERNEL_OK")
</pallas_src>

<mosaic_0001>
module attributes {stable_mosaic.version = 11 : i64} {
  func.func @_fused_kernel(%arg0: i32, %arg1: memref<8x1xi32, #tpu.memory_space<vmem>>, %arg2: memref<64x4xbf16, #tpu.memory_space<vmem>>, %arg3: memref<4x128xbf16, #tpu.memory_space<vmem>>, %arg4: memref<128x128xbf16, #tpu.memory_space<vmem>>, %arg5: memref<1x128xf32, #tpu.memory_space<vmem>>, %arg6: memref<128x128xbf16, #tpu.memory_space<vmem>>, %arg7: memref<1x128xf32, #tpu.memory_space<vmem>>, %arg8: memref<8x128xf32, #tpu.memory_space<vmem>>, %arg9: memref<128x128xbf16, #tpu.memory_space<vmem>>, %arg10: memref<8x128xf32, #tpu.memory_space<vmem>>, %arg11: memref<8x128xf32, #tpu.memory_space<vmem>>) attributes {dimension_semantics = [#tpu.dimension_semantics<arbitrary>], iteration_bounds = array<i64: 1>, scalar_prefetch = 0 : i64, scratch_operands = 0 : i64, tpu.core_type = #tpu.core_type<tc>, window_params = [{pipeline_mode = #tpu.pipeline_mode<synchronous>, transform_indices = @transform_0, window_bounds = array<i64: 8, 1>}, {pipeline_mode = #tpu.pipeline_mode<synchronous>, transform_indices = @transform_1, window_bounds = array<i64: 64, 4>}, {pipeline_mode = #tpu.pipeline_mode<synchronous>, transform_indices = @transform_2, window_bounds = array<i64: 4, 128>}, {pipeline_mode = #tpu.pipeline_mode<synchronous>, transform_indices = @transform_3, window_bounds = array<i64: 128, 128>}, {pipeline_mode = #tpu.pipeline_mode<synchronous>, transform_indices = @transform_4, window_bounds = array<i64: 1, 128>}, {pipeline_mode = #tpu.pipeline_mode<synchronous>, transform_indices = @transform_5, window_bounds = array<i64: 128, 128>}, {pipeline_mode = #tpu.pipeline_mode<synchronous>, transform_indices = @transform_6, window_bounds = array<i64: 1, 128>}, {pipeline_mode = #tpu.pipeline_mode<synchronous>, transform_indices = @transform_7, window_bounds = array<i64: 8, 128>}, {pipeline_mode = #tpu.pipeline_mode<synchronous>, transform_indices = @transform_8, window_bounds = array<i64: 128, 128>}, {pipeline_mode = #tpu.pipeline_mode<synchronous>, transform_indices = @transform_9, window_bounds = array<i64: 8, 128>}, {pipeline_mode = #tpu.pipeline_mode<synchronous>, transform_indices = @transform_10, window_bounds = array<i64: 8, 128>}]} {
    %c0 = arith.constant 0 : index
    %c0_0 = arith.constant 0 : index
    %0 = vector.load %arg2[%c0, %c0_0] : memref<64x4xbf16, #tpu.memory_space<vmem>>, vector<64x4xbf16>
    %c0_1 = arith.constant 0 : index
    %c0_2 = arith.constant 0 : index
    %1 = vector.load %arg3[%c0_1, %c0_2] : memref<4x128xbf16, #tpu.memory_space<vmem>>, vector<4x128xbf16>
    %cst = arith.constant dense<0.000000e+00> : vector<64x128xf32>
    %2 = tpu.matmul %0, %1, %cst {dimension_numbers = #tpu.dot_dimension_numbers<[1], [0], [0], [1], [0, 0, 1, 1], [], []>} : vector<64x4xbf16>, vector<4x128xbf16>, vector<64x128xf32> -> vector<64x128xf32>
    %c0_3 = arith.constant 0 : index
    %c0_4 = arith.constant 0 : index
    %3 = vector.load %arg5[%c0_3, %c0_4] : memref<1x128xf32, #tpu.memory_space<vmem>>, vector<1x128xf32>
    %4 = vector.broadcast %3 : vector<1x128xf32> to vector<64x128xf32>
    %5 = arith.addf %2, %4 : vector<64x128xf32>
    %c0_5 = arith.constant 0 : index
    %c0_6 = arith.constant 0 : index
    %6 = vector.load %arg4[%c0_5, %c0_6] : memref<128x128xbf16, #tpu.memory_space<vmem>>, vector<128x128xbf16>
    %7 = tpu.iota {dimensions = array<i32: 1>} : vector<8x128xi32>
    %c64_i32 = arith.constant 64 : i32
    %8 = vector.broadcast %c64_i32 : i32 to vector<8x128xi32>
    %9 = arith.cmpi sge, %7, %8 : vector<8x128xi32>
    %c96_i32 = arith.constant 96 : i32
    %10 = vector.broadcast %c96_i32 : i32 to vector<8x128xi32>
    %11 = arith.cmpi slt, %7, %10 : vector<8x128xi32>
    %12 = arith.andi %9, %11 : vector<8x128xi1>
    %cst_7 = arith.constant 0.000000e+00 : f32
    %13 = vector.broadcast %cst_7 : f32 to vector<8x128xf32>
    %cst_8 = arith.constant 0.000000e+00 : f32
    %14 = vector.broadcast %cst_8 : f32 to vector<8x128xf32>
    %15 = vector.extract_strided_slice %5 {offsets = [0, 0], sizes = [8, 128], strides = [1, 1]} : vector<64x128xf32> to vector<8x128xf32>
    %16 = arith.truncf %13 : vector<8x128xf32> to vector<8x128xbf16>
    %cst_9 = arith.constant dense<0.000000e+00> : vector<8x128xf32>
    %17 = tpu.matmul %16, %6, %cst_9 {dimension_numbers = #tpu.dot_dimension_numbers<[1], [0], [0], [1], [0, 0, 1, 1], [], []>} : vector<8x128xbf16>, vector<128x128xbf16>, vector<8x128xf32> -> vector<8x128xf32>
    %18 = arith.addf %15, %17 : vector<8x128xf32>
    %19 = math.tanh %18 : vector<8x128xf32>
    %20 = arith.negf %18 : vector<8x128xf32>
    %21 = math.exp %20 : vector<8x128xf32>
    %cst_10 = arith.constant 1.000000e+00 : f32
    %22 = vector.broadcast %cst_10 : f32 to vector<8x128xf32>
    %23 = arith.addf %22, %21 : vector<8x128xf32>
    %24 = arith.divf %22, %23 : vector<8x128xf32>
    %25 = arith.select %12, %19, %24 : vector<8x128xi1>, vector<8x128xf32>
    %c96_i32_11 = arith.constant 96 : i32
    %26 = tpu.dynamic_rotate %25 by %c96_i32_11 dim 1 : vector<8x128xf32>, i32 -> vector<8x128xf32>
    %c64_i32_12 = arith.constant 64 : i32
    %27 = tpu.dynamic_rotate %25 by %c64_i32_12 dim 1 : vector<8x128xf32>, i32 -> vector<8x128xf32>
    %c32_i32 = arith.constant 32 : i32
    %28 = tpu.dynamic_rotate %25 by %c32_i32 dim 1 : vector<8x128xf32>, i32 -> vector<8x128xf32>
    %29 = arith.mulf %26, %14 : vector<8x128xf32>
    %30 = arith.mulf %25, %27 : vector<8x128xf32>
    %31 = arith.addf %29, %30 : vector<8x128xf32>
    %32 = math.tanh %31 : vector<8x128xf32>
    %33 = arith.mulf %28, %32 : vector<8x128xf32>
    %34 = vector.extract_strided_slice %5 {offsets = [8, 0], sizes = [8, 128], strides = [1, 1]} : vector<64x128xf32> to vector<8x128xf32>
    %35 = arith.truncf %33 : vector<8x128xf32> to vector<8x128xbf16>
    %cst_13 = arith.constant dense<0.000000e+00> : vector<8x128xf32>
    %36 = tpu.matmul %35, %6, %cst_13 {dimension_numbers = #tpu.dot_dimension_numbers<[1], [0], [0], [1], [0, 0, 1, 1], [], []>} : vector<8x128xbf16>, vector<128x128xbf16>, vector<8x128xf32> -> vector<8x128xf32>
    %37 = arith.addf %34, %36 : vector<8x128xf32>
    %38 = math.tanh %37 : vector<8x128xf32>
    %39 = arith.negf %37 : vector<8x128xf32>
    %40 = math.exp %39 : vector<8x128xf32>
    %cst_14 = arith.constant 1.000000e+00 : f32
    %41 = vector.broadcast %cst_14 : f32 to vector<8x128xf32>
    %42 = arith.addf %41, %40 : vector<8x128xf32>
    %43 = arith.divf %41, %42 : vector<8x128xf32>
    %44 = arith.select %12, %38, %43 : vector<8x128xi1>, vector<8x128xf32>
    %c96_i32_15 = arith.constant 96 : i32
    %45 = tpu.dynamic_rotate %44 by %c96_i32_15 dim 1 : vector<8x128xf32>, i32 -> vector<8x128xf32>
    %c64_i32_16 = arith.constant 64 : i32
    %46 = tpu.dynamic_rotate %44 by %c64_i32_16 dim 1 : vector<8x128xf32>, i32 -> vector<8x128xf32>
    %c32_i32_17 = arith.constant 32 : i32
    %47 = tpu.dynamic_rotate %44 by %c32_i32_17 dim 1 : vector<8x128xf32>, i32 -> vector<8x128xf32>
    %48 = arith.mulf %45, %31 : vector<8x128xf32>
    %49 = arith.mulf %44, %46 : vector<8x128xf32>
    %50 = arith.addf %48, %49 : vector<8x128xf32>
    %51 = math.tanh %50 : vector<8x128xf32>
    %52 = arith.mulf %47, %51 : vector<8x128xf32>
    %53 = vector.extract_strided_slice %5 {offsets = [16, 0], sizes = [8, 128], strides = [1, 1]} : vector<64x128xf32> to vector<8x128xf32>
    %54 = arith.truncf %52 : vector<8x128xf32> to vector<8x128xbf16>
    %cst_18 = arith.constant dense<0.000000e+00> : vector<8x128xf32>
    %55 = tpu.matmul %54, %6, %cst_18 {dimension_numbers = #tpu.dot_dimension_numbers<[1], [0], [0], [1], [0, 0, 1, 1], [], []>} : vector<8x128xbf16>, vector<128x128xbf16>, vector<8x128xf32> -> vector<8x128xf32>
    %56 = arith.addf %53, %55 : vector<8x128xf32>
    %57 = math.tanh %56 : vector<8x128xf32>
    %58 = arith.negf %56 : vector<8x128xf32>
    %59 = math.exp %58 : vector<8x128xf32>
    %cst_19 = arith.constant 1.000000e+00 : f32
    %60 = vector.broadcast %cst_19 : f32 to vector<8x128xf32>
    %61 = arith.addf %60, %59 : vector<8x128xf32>
    %62 = arith.divf %60, %61 : vector<8x128xf32>
    %63 = arith.select %12, %57, %62 : vector<8x128xi1>, vector<8x128xf32>
    %c96_i32_20 = arith.constant 96 : i32
    %64 = tpu.dynamic_rotate %63 by %c96_i32_20 dim 1 : vector<8x128xf32>, i32 -> vector<8x128xf32>
    %c64_i32_21 = arith.constant 64 : i32
    %65 = tpu.dynamic_rotate %63 by %c64_i32_21 dim 1 : vector<8x128xf32>, i32 -> vector<8x128xf32>
    %c32_i32_22 = arith.constant 32 : i32
    %66 = tpu.dynamic_rotate %63 by %c32_i32_22 dim 1 : vector<8x128xf32>, i32 -> vector<8x128xf32>
    %67 = arith.mulf %64, %50 : vector<8x128xf32>
    %68 = arith.mulf %63, %65 : vector<8x128xf32>
    %69 = arith.addf %67, %68 : vector<8x128xf32>
    %70 = math.tanh %69 : vector<8x128xf32>
    %71 = arith.mulf %66, %70 : vector<8x128xf32>
    %72 = vector.extract_strided_slice %5 {offsets = [24, 0], sizes = [8, 128], strides = [1, 1]} : vector<64x128xf32> to vector<8x128xf32>
    %73 = arith.truncf %71 : vector<8x128xf32> to vector<8x128xbf16>
    %cst_23 = arith.constant dense<0.000000e+00> : vector<8x128xf32>
    %74 = tpu.matmul %73, %6, %cst_23 {dimension_numbers = #tpu.dot_dimension_numbers<[1], [0], [0], [1], [0, 0, 1, 1], [], []>} : vector<8x128xbf16>, vector<128x128xbf16>, vector<8x128xf32> -> vector<8x128xf32>
    %75 = arith.addf %72, %74 : vector<8x128xf32>
    %76 = math.tanh %75 : vector<8x128xf32>
    %77 = arith.negf %75 : vector<8x128xf32>
    %78 = math.exp %77 : vector<8x128xf32>
    %cst_24 = arith.constant 1.000000e+00 : f32
    %79 = vector.broadcast %cst_24 : f32 to vector<8x128xf32>
    %80 = arith.addf %79, %78 : vector<8x128xf32>
    %81 = arith.divf %79, %80 : vector<8x128xf32>
    %82 = arith.select %12, %76, %81 : vector<8x128xi1>, vector<8x128xf32>
    %c96_i32_25 = arith.constant 96 : i32
    %83 = tpu.dynamic_rotate %82 by %c96_i32_25 dim 1 : vector<8x128xf32>, i32 -> vector<8x128xf32>
    %c64_i32_26 = arith.constant 64 : i32
    %84 = tpu.dynamic_rotate %82 by %c64_i32_26 dim 1 : vector<8x128xf32>, i32 -> vector<8x128xf32>
    %c32_i32_27 = arith.constant 32 : i32
    %85 = tpu.dynamic_rotate %82 by %c32_i32_27 dim 1 : vector<8x128xf32>, i32 -> vector<8x128xf32>
    %86 = arith.mulf %83, %69 : vector<8x128xf32>
    %87 = arith.mulf %82, %84 : vector<8x128xf32>
    %88 = arith.addf %86, %87 : vector<8x128xf32>
    %89 = math.tanh %88 : vector<8x128xf32>
    %90 = arith.mulf %85, %89 : vector<8x128xf32>
    %91 = vector.extract_strided_slice %5 {offsets = [32, 0], sizes = [8, 128], strides = [1, 1]} : vector<64x128xf32> to vector<8x128xf32>
    %92 = arith.truncf %90 : vector<8x128xf32> to vector<8x128xbf16>
    %cst_28 = arith.constant dense<0.000000e+00> : vector<8x128xf32>
    %93 = tpu.matmul %92, %6, %cst_28 {dimension_numbers = #tpu.dot_dimension_numbers<[1], [0], [0], [1], [0, 0, 1, 1], [], []>} : vector<8x128xbf16>, vector<128x128xbf16>, vector<8x128xf32> -> vector<8x128xf32>
    %94 = arith.addf %91, %93 : vector<8x128xf32>
    %95 = math.tanh %94 : vector<8x128xf32>
    %96 = arith.negf %94 : vector<8x128xf32>
    %97 = math.exp %96 : vector<8x128xf32>
    %cst_29 = arith.constant 1.000000e+00 : f32
    %98 = vector.broadcast %cst_29 : f32 to vector<8x128xf32>
    %99 = arith.addf %98, %97 : vector<8x128xf32>
    %100 = arith.divf %98, %99 : vector<8x128xf32>
    %101 = arith.select %12, %95, %100 : vector<8x128xi1>, vector<8x128xf32>
    %c96_i32_30 = arith.constant 96 : i32
    %102 = tpu.dynamic_rotate %101 by %c96_i32_30 dim 1 : vector<8x128xf32>, i32 -> vector<8x128xf32>
    %c64_i32_31 = arith.constant 64 : i32
    %103 = tpu.dynamic_rotate %101 by %c64_i32_31 dim 1 : vector<8x128xf32>, i32 -> vector<8x128xf32>
    %c32_i32_32 = arith.constant 32 : i32
    %104 = tpu.dynamic_rotate %101 by %c32_i32_32 dim 1 : vector<8x128xf32>, i32 -> vector<8x128xf32>
    %105 = arith.mulf %102, %88 : vector<8x128xf32>
    %106 = arith.mulf %101, %103 : vector<8x128xf32>
    %107 = arith.addf %105, %106 : vector<8x128xf32>
    %108 = math.tanh %107 : vector<8x128xf32>
    %109 = arith.mulf %104, %108 : vector<8x128xf32>
    %110 = vector.extract_strided_slice %5 {offsets = [40, 0], sizes = [8, 128], strides = [1, 1]} : vector<64x128xf32> to vector<8x128xf32>
    %111 = arith.truncf %109 : vector<8x128xf32> to vector<8x128xbf16>
    %cst_33 = arith.constant dense<0.000000e+00> : vector<8x128xf32>
    %112 = tpu.matmul %111, %6, %cst_33 {dimension_numbers = #tpu.dot_dimension_numbers<[1], [0], [0], [1], [0, 0, 1, 1], [], []>} : vector<8x128xbf16>, vector<128x128xbf16>, vector<8x128xf32> -> vector<8x128xf32>
    %113 = arith.addf %110, %112 : vector<8x128xf32>
    %114 = math.tanh %113 : vector<8x128xf32>
    %115 = arith.negf %113 : vector<8x128xf32>
    %116 = math.exp %115 : vector<8x128xf32>
    %cst_34 = arith.constant 1.000000e+00 : f32
    %117 = vector.broadcast %cst_34 : f32 to vector<8x128xf32>
    %118 = arith.addf %117, %116 : vector<8x128xf32>
    %119 = arith.divf %117, %118 : vector<8x128xf32>
    %120 = arith.select %12, %114, %119 : vector<8x128xi1>, vector<8x128xf32>
    %c96_i32_35 = arith.constant 96 : i32
    %121 = tpu.dynamic_rotate %120 by %c96_i32_35 dim 1 : vector<8x128xf32>, i32 -> vector<8x128xf32>
    %c64_i32_36 = arith.constant 64 : i32
    %122 = tpu.dynamic_rotate %120 by %c64_i32_36 dim 1 : vector<8x128xf32>, i32 -> vector<8x128xf32>
    %c32_i32_37 = arith.constant 32 : i32
    %123 = tpu.dynamic_rotate %120 by %c32_i32_37 dim 1 : vector<8x128xf32>, i32 -> vector<8x128xf32>
    %124 = arith.mulf %121, %107 : vector<8x128xf32>
    %125 = arith.mulf %120, %122 : vector<8x128xf32>
    %126 = arith.addf %124, %125 : vector<8x128xf32>
    %127 = math.tanh %126 : vector<8x128xf32>
    %128 = arith.mulf %123, %127 : vector<8x128xf32>
    %129 = vector.extract_strided_slice %5 {offsets = [48, 0], sizes = [8, 128], strides = [1, 1]} : vector<64x128xf32> to vector<8x128xf32>
    %130 = arith.truncf %128 : vector<8x128xf32> to vector<8x128xbf16>
    %cst_38 = arith.constant dense<0.000000e+00> : vector<8x128xf32>
    %131 = tpu.matmul %130, %6, %cst_38 {dimension_numbers = #tpu.dot_dimension_numbers<[1], [0], [0], [1], [0, 0, 1, 1], [], []>} : vector<8x128xbf16>, vector<128x128xbf16>, vector<8x128xf32> -> vector<8x128xf32>
    %132 = arith.addf %129, %131 : vector<8x128xf32>
    %133 = math.tanh %132 : vector<8x128xf32>
    %134 = arith.negf %132 : vector<8x128xf32>
    %135 = math.exp %134 : vector<8x128xf32>
    %cst_39 = arith.constant 1.000000e+00 : f32
    %136 = vector.broadcast %cst_39 : f32 to vector<8x128xf32>
    %137 = arith.addf %136, %135 : vector<8x128xf32>
    %138 = arith.divf %136, %137 : vector<8x128xf32>
    %139 = arith.select %12, %133, %138 : vector<8x128xi1>, vector<8x128xf32>
    %c96_i32_40 = arith.constant 96 : i32
    %140 = tpu.dynamic_rotate %139 by %c96_i32_40 dim 1 : vector<8x128xf32>, i32 -> vector<8x128xf32>
    %c64_i32_41 = arith.constant 64 : i32
    %141 = tpu.dynamic_rotate %139 by %c64_i32_41 dim 1 : vector<8x128xf32>, i32 -> vector<8x128xf32>
    %c32_i32_42 = arith.constant 32 : i32
    %142 = tpu.dynamic_rotate %139 by %c32_i32_42 dim 1 : vector<8x128xf32>, i32 -> vector<8x128xf32>
    %143 = arith.mulf %140, %126 : vector<8x128xf32>
    %144 = arith.mulf %139, %141 : vector<8x128xf32>
    %145 = arith.addf %143, %144 : vector<8x128xf32>
    %146 = math.tanh %145 : vector<8x128xf32>
    %147 = arith.mulf %142, %146 : vector<8x128xf32>
    %148 = vector.extract_strided_slice %5 {offsets = [56, 0], sizes = [8, 128], strides = [1, 1]} : vector<64x128xf32> to vector<8x128xf32>
    %149 = arith.truncf %147 : vector<8x128xf32> to vector<8x128xbf16>
    %cst_43 = arith.constant dense<0.000000e+00> : vector<8x128xf32>
    %150 = tpu.matmul %149, %6, %cst_43 {dimension_numbers = #tpu.dot_dimension_numbers<[1], [0], [0], [1], [0, 0, 1, 1], [], []>} : vector<8x128xbf16>, vector<128x128xbf16>, vector<8x128xf32> -> vector<8x128xf32>
    %151 = arith.addf %148, %150 : vector<8x128xf32>
    %152 = math.tanh %151 : vector<8x128xf32>
    %153 = arith.negf %151 : vector<8x128xf32>
    %154 = math.exp %153 : vector<8x128xf32>
    %cst_44 = arith.constant 1.000000e+00 : f32
    %155 = vector.broadcast %cst_44 : f32 to vector<8x128xf32>
    %156 = arith.addf %155, %154 : vector<8x128xf32>
    %157 = arith.divf %155, %156 : vector<8x128xf32>
    %158 = arith.select %12, %152, %157 : vector<8x128xi1>, vector<8x128xf32>
    %c96_i32_45 = arith.constant 96 : i32
    %159 = tpu.dynamic_rotate %158 by %c96_i32_45 dim 1 : vector<8x128xf32>, i32 -> vector<8x128xf32>
    %c64_i32_46 = arith.constant 64 : i32
    %160 = tpu.dynamic_rotate %158 by %c64_i32_46 dim 1 : vector<8x128xf32>, i32 -> vector<8x128xf32>
    %c32_i32_47 = arith.constant 32 : i32
    %161 = tpu.dynamic_rotate %158 by %c32_i32_47 dim 1 : vector<8x128xf32>, i32 -> vector<8x128xf32>
    %162 = arith.mulf %159, %145 : vector<8x128xf32>
    %163 = arith.mulf %158, %160 : vector<8x128xf32>
    %164 = arith.addf %162, %163 : vector<8x128xf32>
    %165 = math.tanh %164 : vector<8x128xf32>
    %166 = arith.mulf %161, %165 : vector<8x128xf32>
    %167 = tpu.iota {dimensions = array<i32: 1>} : vector<8x8xi32>
    %c0_48 = arith.constant 0 : index
    %c0_49 = arith.constant 0 : index
    %168 = vector.load %arg1[%c0_48, %c0_49] : memref<8x1xi32, #tpu.memory_space<vmem>>, vector<8x1xi32>
    %169 = vector.broadcast %168 : vector<8x1xi32> to vector<8x8xi32>
    %170 = arith.cmpi eq, %167, %169 : vector<8x8xi32>
    %cst_50 = arith.constant 1.000000e+00 : f32
    %cst_51 = arith.constant 0.000000e+00 : f32
    %171 = vector.broadcast %cst_50 : f32 to vector<8x8xf32>
    %172 = vector.broadcast %cst_51 : f32 to vector<8x8xf32>
    %173 = arith.select %170, %171, %172 : vector<8x8xi1>, vector<8x8xf32>
    %174 = arith.truncf %173 : vector<8x8xf32> to vector<8x8xbf16>
    %175 = arith.truncf %166 : vector<8x128xf32> to vector<8x128xbf16>
    %cst_52 = arith.constant dense<0.000000e+00> : vector<8x128xf32>
    %176 = tpu.matmul %174, %175, %cst_52 {dimension_numbers = #tpu.dot_dimension_numbers<[1], [0], [0], [1], [0, 0, 1, 1], [], []>} : vector<8x8xbf16>, vector<8x128xbf16>, vector<8x128xf32> -> vector<8x128xf32>
    %177 = arith.truncf %176 : vector<8x128xf32> to vector<8x128xbf16>
    %c0_53 = arith.constant 0 : index
    %c0_54 = arith.constant 0 : index
    %178 = vector.load %arg6[%c0_53, %c0_54] : memref<128x128xbf16, #tpu.memory_space<vmem>>, vector<128x128xbf16>
    %cst_55 = arith.constant dense<0.000000e+00> : vector<8x128xf32>
    %179 = tpu.matmul %177, %178, %cst_55 {dimension_numbers = #tpu.dot_dimension_numbers<[1], [0], [0], [1], [0, 0, 1, 1], [], []>} : vector<8x128xbf16>, vector<128x128xbf16>, vector<8x128xf32> -> vector<8x128xf32>
    %c0_56 = arith.constant 0 : index
    %c0_57 = arith.constant 0 : index
    %180 = vector.load %arg7[%c0_56, %c0_57] : memref<1x128xf32, #tpu.memory_space<vmem>>, vector<1x128xf32>
    %181 = vector.broadcast %180 : vector<1x128xf32> to vector<8x128xf32>
    %182 = arith.addf %179, %181 : vector<8x128xf32>
    %cst_58 = arith.constant 0.000000e+00 : f32
    %183 = vector.broadcast %cst_58 : f32 to vector<8x128xf32>
    %184 = arith.maximumf %182, %183 : vector<8x128xf32>
    %c0_59 = arith.constant 0 : index
    %c0_60 = arith.constant 0 : index
    %185 = vector.load %arg8[%c0_59, %c0_60] : memref<8x128xf32, #tpu.memory_space<vmem>>, vector<8x128xf32>
    %186 = arith.mulf %184, %185 : vector<8x128xf32>
    %187 = arith.truncf %186 : vector<8x128xf32> to vector<8x128xbf16>
    %c0_61 = arith.constant 0 : index
    %c0_62 = arith.constant 0 : index
    %188 = vector.load %arg9[%c0_61, %c0_62] : memref<128x128xbf16, #tpu.memory_space<vmem>>, vector<128x128xbf16>
    %cst_63 = arith.constant dense<0.000000e+00> : vector<8x128xf32>
    %189 = tpu.matmul %187, %188, %cst_63 {dimension_numbers = #tpu.dot_dimension_numbers<[1], [0], [0], [1], [0, 0, 1, 1], [], []>} : vector<8x128xbf16>, vector<128x128xbf16>, vector<8x128xf32> -> vector<8x128xf32>
    %c0_64 = arith.constant 0 : index
    %c0_65 = arith.constant 0 : index
    %190 = vector.load %arg10[%c0_64, %c0_65] : memref<8x128xf32, #tpu.memory_space<vmem>>, vector<8x128xf32>
    %191 = arith.addf %189, %190 : vector<8x128xf32>
    %192 = tpu.iota {dimensions = array<i32: 1>} : vector<8x128xi32>
    %c1_i32 = arith.constant 1 : i32
    %193 = vector.broadcast %c1_i32 : i32 to vector<8x128xi32>
    %194 = arith.cmpi sge, %192, %193 : vector<8x128xi32>
    %c3_i32 = arith.constant 3 : i32
    %195 = vector.broadcast %c3_i32 : i32 to vector<8x128xi32>
    %196 = arith.cmpi slt, %192, %195 : vector<8x128xi32>
    %197 = arith.andi %194, %196 : vector<8x128xi1>
    %cst_66 = arith.constant dense<0xFF800000> : vector<8xf32>
    %198 = vector.multi_reduction <maximumf>, %191, %cst_66 [1] : vector<8x128xf32> to vector<8xf32>
    %199 = vector.shape_cast %198 : vector<8xf32> to vector<8x1xf32>
    %200 = vector.broadcast %199 : vector<8x1xf32> to vector<8x128xf32>
    %201 = arith.subf %191, %200 : vector<8x128xf32>
    %202 = math.exp %201 : vector<8x128xf32>
    %cst_67 = arith.constant 0.000000e+00 : f32
    %203 = vector.broadcast %cst_67 : f32 to vector<8x128xf32>
    %204 = arith.select %197, %202, %203 : vector<8x128xi1>, vector<8x128xf32>
    %cst_68 = arith.constant dense<0.000000e+00> : vector<8xf32>
    %205 = vector.multi_reduction <add>, %204, %cst_68 [1] : vector<8x128xf32> to vector<8xf32>
    %206 = vector.shape_cast %205 : vector<8xf32> to vector<8x1xf32>
    %207 = vector.broadcast %206 : vector<8x1xf32> to vector<8x128xf32>
    %208 = arith.divf %202, %207 : vector<8x128xf32>
    %209 = arith.select %197, %208, %191 : vector<8x128xi1>, vector<8x128xf32>
    %c0_69 = arith.constant 0 : index
    %c0_70 = arith.constant 0 : index
    %210 = vector.load %arg11[%c0_69, %c0_70] : memref<8x128xf32, #tpu.memory_space<vmem>>, vector<8x128xf32>
    tpu.vector_store %arg11[%c0_69, %c0_70], %209 {strides = array<i32>} : memref<8x128xf32, #tpu.memory_space<vmem>>, vector<8x128xf32>,
    return
  }
  func.func @transform_0(%arg0: i32) -> (i32, i32) {
    %c0_i32 = arith.constant 0 : i32
    %c0_i32_0 = arith.constant 0 : i32
    %c0_i32_1 = arith.constant 0 : i32
    return %c0_i32, %c0_i32_0 : i32, i32
  }
  func.func @transform_1(%arg0: i32) -> (i32, i32) {
    %c0_i32 = arith.constant 0 : i32
    %c0_i32_0 = arith.constant 0 : i32
    %c0_i32_1 = arith.constant 0 : i32
    return %c0_i32, %c0_i32_0 : i32, i32
  }
  func.func @transform_2(%arg0: i32) -> (i32, i32) {
    %c0_i32 = arith.constant 0 : i32
    %c0_i32_0 = arith.constant 0 : i32
    %c0_i32_1 = arith.constant 0 : i32
    return %c0_i32, %c0_i32_0 : i32, i32
  }
  func.func @transform_3(%arg0: i32) -> (i32, i32) {
    %c0_i32 = arith.constant 0 : i32
    %c0_i32_0 = arith.constant 0 : i32
    %c0_i32_1 = arith.constant 0 : i32
    return %c0_i32, %c0_i32_0 : i32, i32
  }
  func.func @transform_4(%arg0: i32) -> (i32, i32) {
    %c0_i32 = arith.constant 0 : i32
    %c0_i32_0 = arith.constant 0 : i32
    %c0_i32_1 = arith.constant 0 : i32
    return %c0_i32, %c0_i32_0 : i32, i32
  }
  func.func @transform_5(%arg0: i32) -> (i32, i32) {
    %c0_i32 = arith.constant 0 : i32
    %c0_i32_0 = arith.constant 0 : i32
    %c0_i32_1 = arith.constant 0 : i32
    return %c0_i32, %c0_i32_0 : i32, i32
  }
  func.func @transform_6(%arg0: i32) -> (i32, i32) {
    %c0_i32 = arith.constant 0 : i32
    %c0_i32_0 = arith.constant 0 : i32
    %c0_i32_1 = arith.constant 0 : i32
    return %c0_i32, %c0_i32_0 : i32, i32
  }
  func.func @transform_7(%arg0: i32) -> (i32, i32) {
    %c0_i32 = arith.constant 0 : i32
    %c0_i32_0 = arith.constant 0 : i32
    %c0_i32_1 = arith.constant 0 : i32
    return %c0_i32, %c0_i32_0 : i32, i32
  }
  func.func @transform_8(%arg0: i32) -> (i32, i32) {
    %c0_i32 = arith.constant 0 : i32
    %c0_i32_0 = arith.constant 0 : i32
    %c0_i32_1 = arith.constant 0 : i32
    return %c0_i32, %c0_i32_0 : i32, i32
  }
  func.func @transform_9(%arg0: i32) -> (i32, i32) {
    %c0_i32 = arith.constant 0 : i32
    %c0_i32_0 = arith.constant 0 : i32
    %c0_i32_1 = arith.constant 0 : i32
    return %c0_i32, %c0_i32_0 : i32, i32
  }
  func.func @transform_10(%arg0: i32) -> (i32, i32) {
    %c0_i32 = arith.constant 0 : i32
    %c0_i32_0 = arith.constant 0 : i32
    %c0_i32_1 = arith.constant 0 : i32
    return %c0_i32, %c0_i32_0 : i32, i32
  }
}

</mosaic_0001>

<bundles_post_ra>
// kernel: my_model_forward.1
= control target key start
LH: loop header
LB: loop body
LE: loop exit
PB: predicated region body
PF: predicated region fallthrough
CT: control target
= control target key end

     0   :  { %vm82_vm0 = vcmask 1041408   ;;  %v1014_v1 = vmov 0   ;;  %vm69_vm1 = vcmask 31744   ;;  %v131_v22 = vlaneseq  ;;  %s1015_s16 = smov 32   ;;  %s1016_s17 = smov 96   ;;  %s1344_s3 = inlined_call_operand.vmem [shape: bf16[128,128], index: 3, kind: input, shape index: {}]   ;;  %s1345_s2 = inlined_call_operand.vmem [shape: bf16[4,128], index: 2, kind: input, shape index: {}]   ;;  %s1346_s1 = inlined_call_operand.vmem [shape: bf16[64,4], index: 1, kind: input, shape index: {}]   ;;  %s1347_s4 = inlined_call_operand.vmem [shape: f32[1,128], index: 4, kind: input, shape index: {}]   ;;  %s1348_s0 = inlined_call_operand.vmem [shape: s32[8,1], index: 0, kind: input, shape index: {}]   ;;  %s1349_s5 = inlined_call_operand.vmem [shape: bf16[128,128], index: 5, kind: input, shape index: {}]   ;;  %s1350_s6 = inlined_call_operand.vmem [shape: f32[1,128], index: 6, kind: input, shape index: {}]   ;;  %s1351_s8 = inlined_call_operand.vmem [shape: bf16[128,128], index: 8, kind: input, shape index: {}]   ;;  %s1352_s7 = inlined_call_operand.vmem [shape: f32[8,128], index: 7, kind: input, shape index: {}]   ;;  %s1353_s9 = inlined_call_operand.vmem [shape: f32[8,128], index: 9, kind: input, shape index: {}]   ;;  %s1354_s10 = inlined_call_operand.vmem [shape: f32[8,128], index: 10, kind: output, shape index: {}]  }
   0x1   :  { %v1077_v0 = vld [vmem:[%s1344_s3 + $0x38] sm:$0xff]  ;;  %943 = vset.pattern.permute.xlu0 %v1014_v1  ;;  %v44_v2 = vld [vmem:[%s1345_s2] sm:$0x3]  ;;  %v1086_v3 = vld [vmem:[%s1344_s3 + $0x30] sm:$0xff]  ;;  %s1017_s18 = smov 64  }
   0x2   :  { %184 = vmatpush.bf16.msra.mxu1 %v1077_v0  ;;  %v84_v4 = vsel %vm82_vm0, %v44_v2, 0  ;;  %v909_v5 = vld [vmem:[%s1346_s1] sm:$0xff]  ;;  %278 = vmatpush.bf16.msra.mxu3 %v1077_v0  ;;  %v1098_v6 = vld [vmem:[%s1344_s3 + $0x28] sm:$0xff]  ;;  %v1117_v8 = vld [vmem:[%s1344_s3 + $0x18] sm:$0xff]  ;;  %v1190_v24 = vand.u32 127, %v131_v22 }
   0x3   :  { %93 = vmatpush.bf16.msra.mxu0 %v84_v4  ;;  %937 = vmatpush.bf16.msra.mxu2 %v84_v4  ;;  %v1108_v7 = vld [vmem:[%s1344_s3 + $0x20] sm:$0xff]  ;;  %v1126_v9 = vld [vmem:[%s1344_s3 + $0x10] sm:$0xff]  ;;  %v1135_v10 = vld [vmem:[%s1344_s3 + $0x8] sm:$0xff] }
   0x4   :  { %v1144_v11 = vld [vmem:[%s1344_s3] sm:$0xff]  ;;  %v911_v19 = vld [vmem:[%s1346_s1 + $0x10] sm:$0xff]  ;;  %v912_v26 = vld [vmem:[%s1346_s1 + $0x18] sm:$0xff]  ;;  %vm133_vm2 = vcmp.ge.s32.totalorder %v1190_v24, 64  ;;  %vm134_vm3 = vcmp.lt.s32.totalorder %v1190_v24, 96 }
   0x5   :  { %v1180_v12 = vld [vmem:[%s1347_s4] ss:$0 sm:$0xff]  ;;  %vm1199_vm5 = vmand %vm133_vm2, %vm134_vm3  ;;  %v927_v31 = vld [vmem:[%s1349_s5 + $0x30] sm:$0xff] }
   0x6   :  { %185 = vmatpush.bf16.msra.mxu1 %v1086_v3  ;;  %800 = vmatmul.msk.bf16.vlgmr.msra.gmra.mxu0 %vm69_vm1, %v909_v5 }
   0x7   :  { %231 = vmatpush.bf16.msrb.mxu2 %v1077_v0  ;;  %466 = vmatpush.bf16.msrb.mxu0 %v1077_v0 }
   0x8   :  { %279 = vmatpush.bf16.msra.mxu3 %v1086_v3  ;;  %802 = vmatmul.msk.bf16.vlgmr.msra.gmra.mxu2 %vm69_vm1, %v911_v19 }
   0xa   :  { %186 = vmatpush.bf16.msra.mxu1 %v1098_v6 }
   0xb   :  { %232 = vmatpush.bf16.msrb.mxu2 %v1086_v3  ;;  %467 = vmatpush.bf16.msrb.mxu0 %v1086_v3 }
   0xc   :  { %280 = vmatpush.bf16.msra.mxu3 %v1098_v6 }
   0xe   :  { %187 = vmatpush.bf16.msra.mxu1 %v1108_v7 }
   0xf   :  { %233 = vmatpush.bf16.msrb.mxu2 %v1098_v6  ;;  %468 = vmatpush.bf16.msrb.mxu0 %v1098_v6 }
  0x10   :  { %281 = vmatpush.bf16.msra.mxu3 %v1108_v7 }
  0x12   :  { %188 = vmatpush.bf16.msra.mxu1 %v1117_v8 }
  0x13   :  { %234 = vmatpush.bf16.msrb.mxu2 %v1108_v7  ;;  %469 = vmatpush.bf16.msrb.mxu0 %v1108_v7 }
  0x14   :  { %282 = vmatpush.bf16.msra.mxu3 %v1117_v8 }
  0x16   :  { %189 = vmatpush.bf16.msra.mxu1 %v1126_v9 }
  0x17   :  { %235 = vmatpush.bf16.msrb.mxu2 %v1117_v8  ;;  %470 = vmatpush.bf16.msrb.mxu0 %v1117_v8 }
  0x18   :  { %283 = vmatpush.bf16.msra.mxu3 %v1126_v9  ;;  %803 = vmatmul.msk.bf16.gmra.mxu2 %vm69_vm1, %v912_v26 }
  0x1a   :  { %190 = vmatpush.bf16.msra.mxu1 %v1135_v10 }
  0x1b   :  { %236 = vmatpush.bf16.msrb.mxu2 %v1126_v9  ;;  %471 = vmatpush.bf16.msrb.mxu0 %v1126_v9 }
  0x1c   :  { %284 = vmatpush.bf16.msra.mxu3 %v1135_v10 }
  0x1e   :  { %191 = vmatpush.bf16.msra.mxu1 %v1144_v11 }
  0x1f   :  { %237 = vmatpush.bf16.msrb.mxu2 %v1135_v10  ;;  %472 = vmatpush.bf16.msrb.mxu0 %v1135_v10 }
  0x20   :  { %285 = vmatpush.bf16.msra.mxu3 %v1144_v11 }
  0x21   :  { %192 = vmatmul.bf16.vlgmr.msra.gmra.mxu1 %v1014_v1 }
  0x22   :  { %325 = vmatpush.bf16.msrb.mxu1 %v1077_v0 }
  0x23   :  { %238 = vmatpush.bf16.msrb.mxu2 %v1144_v11  ;;  %473 = vmatpush.bf16.msrb.mxu0 %v1144_v11 }
  0x24   :  { %419 = vmatpush.bf16.msrb.mxu3 %v1077_v0 }
  0x26   :  { %326 = vmatpush.bf16.msrb.mxu1 %v1086_v3 }
  0x27   :  { %372 = vmatpush.bf16.msra.mxu2 %v1077_v0 }
  0x28   :  { %420 = vmatpush.bf16.msrb.mxu3 %v1086_v3 }
  0x2a   :  { %327 = vmatpush.bf16.msrb.mxu1 %v1098_v6 }
  0x2b   :  { %373 = vmatpush.bf16.msra.mxu2 %v1086_v3 }
  0x2c   :  { %421 = vmatpush.bf16.msrb.mxu3 %v1098_v6 }
  0x2e   :  { %328 = vmatpush.bf16.msrb.mxu1 %v1108_v7 }
  0x2f   :  { %374 = vmatpush.bf16.msra.mxu2 %v1098_v6 }
  0x30   :  { %422 = vmatpush.bf16.msrb.mxu3 %v1108_v7 }
  0x32   :  { %329 = vmatpush.bf16.msrb.mxu1 %v1117_v8 }
  0x33   :  { %375 = vmatpush.bf16.msra.mxu2 %v1108_v7 }
  0x34   :  { %423 = vmatpush.bf16.msrb.mxu3 %v1117_v8 }
  0x36   :  { %330 = vmatpush.bf16.msrb.mxu1 %v1126_v9 }
  0x37   :  { %376 = vmatpush.bf16.msra.mxu2 %v1117_v8 }
  0x38   :  { %424 = vmatpush.bf16.msrb.mxu3 %v1126_v9 }
  0x3a   :  { %331 = vmatpush.bf16.msrb.mxu1 %v1135_v10 }
  0x3b   :  { %377 = vmatpush.bf16.msra.mxu2 %v1126_v9 }
  0x3c   :  { %425 = vmatpush.bf16.msrb.mxu3 %v1135_v10 }
  0x3e   :  { %332 = vmatpush.bf16.msrb.mxu1 %v1144_v11 }
  0x3f   :  { %378 = vmatpush.bf16.msra.mxu2 %v1135_v10 }
  0x40   :  { %426 = vmatpush.bf16.msrb.mxu3 %v1144_v11 }
  0x42   :  { %513 = vmatpush.bf16.msra.mxu1 %v1077_v0 }
  0x43   :  { %379 = vmatpush.bf16.msra.mxu2 %v1144_v11 }
  0x46   :  { %514 = vmatpush.bf16.msra.mxu1 %v1086_v3 }
  0x4a   :  { %515 = vmatpush.bf16.msra.mxu1 %v1098_v6 }
  0x4e   :  { %516 = vmatpush.bf16.msra.mxu1 %v1108_v7  ;;  %v910_v7 = vld [vmem:[%s1346_s1 + $0x8] sm:$0xff] }
  0x4f   :  { %801 = vmatmul.msk.bf16.gmra.mxu0 %vm69_vm1, %v910_v7 }
  0x52   :  { %517 = vmatpush.bf16.msra.mxu1 %v1117_v8 }
  0x56   :  { %518 = vmatpush.bf16.msra.mxu1 %v1126_v9 }
  0x5a   :  { %519 = vmatpush.bf16.msra.mxu1 %v1135_v10 }
  0x5e   :  { %520 = vmatpush.bf16.msra.mxu1 %v1144_v11 }
  0x83   :  { %v95_v13 = vpop.f32.mrf.mxu0 }
  0x84   :  { %v96_v14 = vadd.f32 %v1180_v12, %v95_v13 }
  0x8b   :  { %v1212_v47 = vpop.f32.mrf.mxu2  ;;  %v97_v51 = vpop.f32.mrf.mxu0 }
  0x8c   :  { %v98_v52 = vadd.f32 %v1180_v12, %v97_v51 }
  0x93   :  { %v1214_v48 = vpop.f32.mrf.mxu2 }
  0x9b   :  { %v1216_v49 = vpop.f32.mrf.mxu2 }
  0x9e   :  { %v193_v15 = vpop.f32.mrf.mxu1 }
  0x9f   :  { %v197_v16 = vadd.f32 %v193_v15, %v96_v14 }
  0xa1   :  { %v836_v17 = vmul.f32 -1.442695, %v197_v16 }
  0xa3   :  { %946 = vpow2.f32 %v836_v17  ;;  %v1218_v50 = vpop.f32.mrf.mxu2 }
  0xa6   :  { %v195_v18 = vpop.f32.mrf.mxu1 }
  0xa9   :  { %v947_v20 = vpop.eup %946 }
  0xaa   :  { %v202_v21 = vadd.f32 1.0, %v947_v20 }
  0xac   :  { %948 = vrcp.f32 %v202_v21  ;;  %v214_v28 = vand.u32 2147483648, %v202_v21  ;;  %v212_v30 = vand.u32 2147483647, %v202_v21  ;;  %vm208_vm6 = vweird.f32 %v202_v21 }
  0xad   :  { %950 = vtanh.f32 %v197_v16 }
  0xae   :  { %v215_v33 = vor.u32 1.1754944e-38, %v214_v28  ;;  %vm213_vm8 = vcmp.eq.f32.partialorder %v212_v30, 8.507059e+37 }
  0xb2   :  { %v949_v23 = vpop.eup %948 }
  0xb3   :  { %v204_v25 = vmul.f32 %v949_v23, %v202_v21  ;;  %vm209_vm4 = vweird.f32 %v949_v23  ;;  %v951_v35 = vpop.eup %950 }
  0xb4   :  { %vm210_vm7 = vmor %vm208_vm6, %vm209_vm4 }
  0xb5   :  { %v205_v27 = vsub.f32 1.0, %v204_v25 }
  0xb7   :  { %v206_v29 = vmul.f32 %v949_v23, %v205_v27 }
  0xb9   :  { %v207_v32 = vadd.f32 %v949_v23, %v206_v29 }
  0xbb   :  { %v211_v34 = vsel %vm210_vm7, %v949_v23, %v207_v32 }
  0xbc   :  { %v216_v36 = vsel %vm213_vm8, %v215_v33, %v211_v34 }
  0xbd   :  { %v218_v37 = vsel %vm1199_vm5, %v951_v35, %v216_v36 }
  0xbe   :  { %223 = vrot.lane.b32.xlu1 %v218_v37, %s1015_s16  ;;  %219 = vrot.lane.b32.xlu0 %v218_v37, %s1016_s17 }
  0xc6   :  { %221 = vrot.lane.b32.xlu0 %v218_v37, %s1017_s18 }
  0xcc   :  { %v100_v18 = vpop.f32.mrf.mxu0 }
  0xcd   :  { %v101_v19 = vadd.f32 %v1180_v12, %v100_v18 }
 0x130   :  { %v220_v38 = vpop.permute.xlu0 %219  ;;  %v224_v44 = vpop.permute.xlu1 %223 }
 0x131   :  { %v225_v40 = vmul.f32 0.0, %v220_v38 }
 0x138   :  { %v222_v39 = vpop.permute.xlu0 %221 }
 0x139   :  { %v226_v41 = vmul.f32 %v222_v39, %v218_v37 }
 0x13b   :  { %v227_v42 = vadd.f32 %v226_v41, %v225_v40 }
 0x13d   :  { %952 = vtanh.f32 %v227_v42 }
 0x143   :  { %v953_v43 = vpop.eup %952 }
 0x144   :  { %v229_v45 = vmul.f32 %v953_v43, %v224_v44 }
 0x146   :  { %v230_v46 = vpack.c.bf16 %v229_v45, %v229_v45 }
 0x148   :  { %239 = vmatmul.bf16.vlgmr.msrb.gmra.mxu2 %v230_v46 }
 0x1cb   :  { %v240_v53 = vpop.f32.mrf.mxu2 }
 0x1cc   :  { %v244_v54 = vadd.f32 %v240_v53, %v98_v52  ;;  %v102_v53 = vpop.f32.mrf.mxu0 }
 0x1ce   :  { %v837_v55 = vmul.f32 -1.442695, %v244_v54 }
 0x1d0   :  { %954 = vpow2.f32 %v837_v55 }
 0x1d3   :  { %v242_v56 = vpop.f32.mrf.mxu2 }
 0x1d6   :  { %v955_v57 = vpop.eup %954 }
 0x1d7   :  { %v249_v58 = vadd.f32 1.0, %v955_v57 }
 0x1d9   :  { %956 = vrcp.f32 %v249_v58  ;;  %v261_v62 = vand.u32 2147483648, %v249_v58  ;;  %v259_v0 = vand.u32 2147483647, %v249_v58  ;;  %vm255_vm10 = vweird.f32 %v249_v58 }
 0x1da   :  { %958 = vtanh.f32 %v244_v54  ;;  %v103_v54 = vadd.f32 %v1180_v12, %v102_v53 }
 0x1db   :  { %v262_v2 = vor.u32 1.1754944e-38, %v261_v62  ;;  %vm260_vm12 = vcmp.eq.f32.partialorder %v259_v0, 8.507059e+37 }
 0x1df   :  { %v957_v59 = vpop.eup %956 }
 0x1e0   :  { %v251_v60 = vmul.f32 %v957_v59, %v249_v58  ;;  %vm256_vm9 = vweird.f32 %v957_v59  ;;  %v959_v4 = vpop.eup %958 }
 0x1e1   :  { %vm257_vm11 = vmor %vm255_vm10, %vm256_vm9 }
 0x1e2   :  { %v252_v61 = vsub.f32 1.0, %v251_v60 }
 0x1e4   :  { %v253_v63 = vmul.f32 %v957_v59, %v252_v61 }
 0x1e6   :  { %v254_v1 = vadd.f32 %v957_v59, %v253_v63 }
 0x1e8   :  { %v258_v3 = vsel %vm257_vm11, %v957_v59, %v254_v1 }
 0x1e9   :  { %v263_v5 = vsel %vm260_vm12, %v262_v2, %v258_v3 }
 0x1ea   :  { %v265_v6 = vsel %vm1199_vm5, %v959_v4, %v263_v5 }
 0x1eb   :  { %268 = vrot.lane.b32.xlu2 %v265_v6, %s1017_s18  ;;  %266 = vrot.lane.b32.xlu1 %v265_v6, %s1016_s17 }
 0x1f3   :  { %270 = vrot.lane.b32.xlu2 %v265_v6, %s1015_s16 }
 0x245   :  { %v269_v8 = vpop.permute.xlu2 %268 }
 0x246   :  { %v273_v10 = vmul.f32 %v269_v8, %v265_v6 }
 0x24d   :  { %v271_v15 = vpop.permute.xlu2 %270 }
 0x25d   :  { %v267_v9 = vpop.permute.xlu1 %266 }
 0x25e   :  { %v272_v11 = vmul.f32 %v267_v9, %v227_v42 }
 0x260   :  { %v274_v13 = vadd.f32 %v273_v10, %v272_v11 }
 0x262   :  { %960 = vtanh.f32 %v274_v13 }
 0x268   :  { %v961_v14 = vpop.eup %960 }
 0x269   :  { %v276_v16 = vmul.f32 %v961_v14, %v271_v15 }
 0x26b   :  { %v277_v17 = vpack.c.bf16 %v276_v16, %v276_v16 }
 0x26d   :  { %286 = vmatmul.bf16.vlgmr.msra.gmra.mxu3 %v277_v17 }
 0x2f0   :  { %v287_v20 = vpop.f32.mrf.mxu3 }
 0x2f1   :  { %v291_v21 = vadd.f32 %v287_v20, %v101_v19  ;;  %v106_v19 = vadd.f32 %v1180_v12, %v1212_v47 }
 0x2f3   :  { %v838_v22 = vmul.f32 -1.442695, %v291_v21 }
 0x2f5   :  { %962 = vpow2.f32 %v838_v22 }
 0x2f8   :  { %v289_v23 = vpop.f32.mrf.mxu3 }
 0x2fb   :  { %v963_v25 = vpop.eup %962 }
 0x2fc   :  { %v296_v26 = vadd.f32 1.0, %v963_v25 }
 0x2fe   :  { %964 = vrcp.f32 %v296_v26  ;;  %v308_v30 = vand.u32 2147483648, %v296_v26  ;;  %v306_v33 = vand.u32 2147483647, %v296_v26  ;;  %vm302_vm14 = vweird.f32 %v296_v26 }
 0x2ff   :  { %966 = vtanh.f32 %v291_v21 }
 0x300   :  { %v309_v35 = vor.u32 1.1754944e-38, %v308_v30  ;;  %vm307_vm0 = vcmp.eq.f32.partialorder %v306_v33, 8.507059e+37 }
 0x304   :  { %v965_v27 = vpop.eup %964 }
 0x305   :  { %v298_v28 = vmul.f32 %v965_v27, %v296_v26  ;;  %vm303_vm13 = vweird.f32 %v965_v27  ;;  %v967_v37 = vpop.eup %966 }
 0x306   :  { %vm304_vm15 = vmor %vm302_vm14, %vm303_vm13 }
 0x307   :  { %v299_v29 = vsub.f32 1.0, %v298_v28 }
 0x309   :  { %v300_v32 = vmul.f32 %v965_v27, %v299_v29 }
 0x30b   :  { %v301_v34 = vadd.f32 %v965_v27, %v300_v32 }
 0x30d   :  { %v305_v36 = vsel %vm304_vm15, %v965_v27, %v301_v34 }
 0x30e   :  { %v310_v38 = vsel %vm307_vm0, %v309_v35, %v305_v36 }
 0x30f   :  { %v312_v39 = vsel %vm1199_vm5, %v967_v37, %v310_v38 }
 0x310   :  { %317 = vrot.lane.b32.xlu2 %v312_v39, %s1015_s16  ;;  %315 = vrot.lane.b32.xlu1 %v312_v39, %s1017_s18 }
 0x311   :  { %313 = vrot.lane.b32.xlu0 %v312_v39, %s1016_s17 }
 0x36a   :  { %v318_v46 = vpop.permute.xlu2 %317 }
 0x382   :  { %v316_v40 = vpop.permute.xlu1 %315 }
 0x383   :  { %v320_v41 = vmul.f32 %v316_v40, %v312_v39  ;;  %v314_v42 = vpop.permute.xlu0 %313 }
 0x384   :  { %v319_v43 = vmul.f32 %v314_v42, %v274_v13 }
 0x386   :  { %v321_v44 = vadd.f32 %v320_v41, %v319_v43 }
 0x388   :  { %968 = vtanh.f32 %v321_v44 }
 0x38e   :  { %v969_v45 = vpop.eup %968 }
 0x38f   :  { %v323_v51 = vmul.f32 %v969_v45, %v318_v46 }
 0x391   :  { %v324_v52 = vpack.c.bf16 %v323_v51, %v323_v51 }
 0x393   :  { %333 = vmatmul.bf16.vlgmr.msrb.gmra.mxu1 %v324_v52  ;;  %v108_v52 = vadd.f32 %v1180_v12, %v1214_v48 }
 0x410   :  { %v334_v55 = vpop.f32.mrf.mxu1 }
 0x411   :  { %v338_v56 = vadd.f32 %v334_v55, %v103_v54 }
 0x413   :  { %v839_v57 = vmul.f32 -1.442695, %v338_v56 }
 0x415   :  { %970 = vpow2.f32 %v839_v57 }
 0x418   :  { %v336_v58 = vpop.f32.mrf.mxu1 }
 0x41b   :  { %v971_v59 = vpop.eup %970 }
 0x41c   :  { %v343_v60 = vadd.f32 1.0, %v971_v59 }
 0x41e   :  { %972 = vrcp.f32 %v343_v60  ;;  %v355_v0 = vand.u32 2147483648, %v343_v60  ;;  %v353_v2 = vand.u32 2147483647, %v343_v60  ;;  %vm349_vm2 = vweird.f32 %v343_v60 }
 0x41f   :  { %974 = vtanh.f32 %v338_v56 }
 0x420   :  { %v356_v4 = vor.u32 1.1754944e-38, %v355_v0  ;;  %vm354_vm4 = vcmp.eq.f32.partialorder %v353_v2, 8.507059e+37 }
 0x424   :  { %v973_v61 = vpop.eup %972 }
 0x425   :  { %v345_v62 = vmul.f32 %v973_v61, %v343_v60  ;;  %vm350_vm1 = vweird.f32 %v973_v61  ;;  %v975_v6 = vpop.eup %974 }
 0x426   :  { %vm351_vm3 = vmor %vm349_vm2, %vm350_vm1 }
 0x427   :  { %v346_v63 = vsub.f32 1.0, %v345_v62 }
 0x429   :  { %v347_v1 = vmul.f32 %v973_v61, %v346_v63 }
 0x42b   :  { %v348_v3 = vadd.f32 %v973_v61, %v347_v1 }
 0x42d   :  { %v352_v5 = vsel %vm351_vm3, %v973_v61, %v348_v3 }
 0x42e   :  { %v357_v7 = vsel %vm354_vm4, %v356_v4, %v352_v5 }
 0x42f   :  { %v359_v8 = vsel %vm1199_vm5, %v975_v6, %v357_v7 }
 0x430   :  { %364 = vrot.lane.b32.xlu2 %v359_v8, %s1015_s16  ;;  %362 = vrot.lane.b32.xlu1 %v359_v8, %s1017_s18 }
 0x431   :  { %360 = vrot.lane.b32.xlu0 %v359_v8, %s1016_s17 }
 0x48a   :  { %v365_v16 = vpop.permute.xlu2 %364 }
 0x4a2   :  { %v363_v9 = vpop.permute.xlu1 %362 }
 0x4a3   :  { %v367_v10 = vmul.f32 %v363_v9, %v359_v8  ;;  %v361_v11 = vpop.permute.xlu0 %360 }
 0x4a4   :  { %v366_v13 = vmul.f32 %v361_v11, %v321_v44 }
 0x4a6   :  { %v368_v14 = vadd.f32 %v367_v10, %v366_v13 }
 0x4a8   :  { %976 = vtanh.f32 %v368_v14 }
 0x4ae   :  { %v977_v15 = vpop.eup %976 }
 0x4af   :  { %v370_v17 = vmul.f32 %v977_v15, %v365_v16  ;;  %v111_v16 = vadd.f32 %v1180_v12, %v1216_v49 }
 0x4b1   :  { %v371_v18 = vpack.c.bf16 %v370_v17, %v370_v17 }
 0x4b3   :  { %380 = vmatmul.bf16.vlgmr.msra.gmra.mxu2 %v371_v18 }
 0x536   :  { %v381_v20 = vpop.f32.mrf.mxu2 }
 0x537   :  { %v385_v21 = vadd.f32 %v381_v20, %v106_v19 }
 0x539   :  { %v840_v22 = vmul.f32 -1.442695, %v385_v21 }
 0x53b   :  { %978 = vpow2.f32 %v840_v22 }
 0x53e   :  { %v383_v23 = vpop.f32.mrf.mxu2 }
 0x541   :  { %v979_v25 = vpop.eup %978 }
 0x542   :  { %v390_v26 = vadd.f32 1.0, %v979_v25 }
 0x544   :  { %980 = vrcp.f32 %v390_v26  ;;  %v402_v30 = vand.u32 2147483648, %v390_v26  ;;  %v400_v33 = vand.u32 2147483647, %v390_v26  ;;  %vm396_vm7 = vweird.f32 %v390_v26 }
 0x545   :  { %982 = vtanh.f32 %v385_v21 }
 0x546   :  { %v403_v47 = vor.u32 1.1754944e-38, %v402_v30  ;;  %vm401_vm9 = vcmp.eq.f32.partialorder %v400_v33, 8.507059e+37 }
 0x54a   :  { %v981_v27 = vpop.eup %980 }
 0x54b   :  { %v392_v28 = vmul.f32 %v981_v27, %v390_v26  ;;  %vm397_vm6 = vweird.f32 %v981_v27  ;;  %v983_v36 = vpop.eup %982 }
 0x54c   :  { %vm398_vm8 = vmor %vm396_vm7, %vm397_vm6  ;;  %vm571_vm7 = vcmask 1043456  }
 0x54d   :  { %v393_v29 = vsub.f32 1.0, %v392_v28 }
 0x54f   :  { %v394_v32 = vmul.f32 %v981_v27, %v393_v29 }
 0x551   :  { %v395_v34 = vadd.f32 %v981_v27, %v394_v32 }
 0x553   :  { %v399_v35 = vsel %vm398_vm8, %v981_v27, %v395_v34  ;;  %vm567_vm8 = vcmask 64512  }
 0x554   :  { %v404_v37 = vsel %vm401_vm9, %v403_v47, %v399_v35  ;;  %vm752_vm9 = vcmp.ge.s32.totalorder %v1190_v24, 1 }
 0x555   :  { %v406_v38 = vsel %vm1199_vm5, %v983_v36, %v404_v37 }
 0x556   :  { %411 = vrot.lane.b32.xlu2 %v406_v38, %s1015_s16  ;;  %409 = vrot.lane.b32.xlu1 %v406_v38, %s1017_s18 }
 0x557   :  { %407 = vrot.lane.b32.xlu0 %v406_v38, %s1016_s17 }
 0x5b0   :  { %v412_v45 = vpop.permute.xlu2 %411 }
 0x5c8   :  { %v410_v39 = vpop.permute.xlu1 %409 }
 0x5c9   :  { %v414_v40 = vmul.f32 %v410_v39, %v406_v38  ;;  %v408_v41 = vpop.permute.xlu0 %407 }
 0x5ca   :  { %v413_v42 = vmul.f32 %v408_v41, %v368_v14 }
 0x5cc   :  { %v415_v43 = vadd.f32 %v414_v40, %v413_v42 }
 0x5ce   :  { %984 = vtanh.f32 %v415_v43 }
 0x5d4   :  { %v985_v44 = vpop.eup %984 }
 0x5d5   :  { %v417_v46 = vmul.f32 %v985_v44, %v412_v45  ;;  %v113_v44 = vadd.f32 %v1180_v12, %v1218_v50 }
 0x5d7   :  { %v418_v51 = vpack.c.bf16 %v417_v46, %v417_v46 }
 0x5d9   :  { %427 = vmatmul.bf16.vlgmr.msrb.gmra.mxu3 %v418_v51 }
 0x65c   :  { %v428_v53 = vpop.f32.mrf.mxu3 }
 0x65d   :  { %v432_v54 = vadd.f32 %v428_v53, %v108_v52 }
 0x65f   :  { %v841_v55 = vmul.f32 -1.442695, %v432_v54 }
 0x661   :  { %986 = vpow2.f32 %v841_v55 }
 0x664   :  { %v430_v56 = vpop.f32.mrf.mxu3 }
 0x667   :  { %v987_v57 = vpop.eup %986 }
 0x668   :  { %v437_v58 = vadd.f32 1.0, %v987_v57 }
 0x66a   :  { %988 = vrcp.f32 %v437_v58  ;;  %v449_v62 = vand.u32 2147483648, %v437_v58  ;;  %v447_v0 = vand.u32 2147483647, %v437_v58  ;;  %vm443_vm11 = vweird.f32 %v437_v58 }
 0x66b   :  { %990 = vtanh.f32 %v432_v54 }
 0x66c   :  { %v450_v48 = vor.u32 1.1754944e-38, %v449_v62  ;;  %vm448_vm13 = vcmp.eq.f32.partialorder %v447_v0, 8.507059e+37 }
 0x670   :  { %v989_v59 = vpop.eup %988 }
 0x671   :  { %v439_v60 = vmul.f32 %v989_v59, %v437_v58  ;;  %vm444_vm10 = vweird.f32 %v989_v59  ;;  %v991_v3 = vpop.eup %990 }
 0x672   :  { %vm445_vm12 = vmor %vm443_vm11, %vm444_vm10  ;;  %vm753_vm10 = vcmp.lt.s32.totalorder %v1190_v24, 3 }
 0x673   :  { %v440_v61 = vsub.f32 1.0, %v439_v60  ;;  %vm1333_vm11 = vmand %vm752_vm9, %vm753_vm10 }
 0x675   :  { %v441_v63 = vmul.f32 %v989_v59, %v440_v61 }
 0x677   :  { %v442_v1 = vadd.f32 %v989_v59, %v441_v63 }
 0x679   :  { %v446_v2 = vsel %vm445_vm12, %v989_v59, %v442_v1  ;;  %v559_v1 = vld [vmem:[%s1348_s0] sm:$0xff] }
 0x67a   :  { %v451_v4 = vsel %vm448_vm13, %v450_v48, %v446_v2  ;;  %v928_v48 = vld [vmem:[%s1349_s5 + $0x38] sm:$0xff]  ;;  %v926_v2 = vld [vmem:[%s1349_s5 + $0x28] sm:$0xff] }
 0x67b   :  { %v453_v5 = vsel %vm1199_vm5, %v991_v3, %v451_v4  ;;  %657 = vmatpush.bf16.msra.mxu3 %v928_v48  ;;  %v925_v3 = vld [vmem:[%s1349_s5 + $0x20] sm:$0xff] }
 0x67c   :  { %458 = vrot.lane.b32.xlu2 %v453_v5, %s1015_s16  ;;  %456 = vrot.lane.b32.xlu1 %v453_v5, %s1017_s18 }
 0x67d   :  { %454 = vrot.lane.b32.xlu0 %v453_v5, %s1016_s17 }
 0x67f   :  { %658 = vmatpush.bf16.msra.mxu3 %v927_v31 }
 0x683   :  { %659 = vmatpush.bf16.msra.mxu3 %v926_v2 }
 0x687   :  { %660 = vmatpush.bf16.msra.mxu3 %v925_v3 }
 0x6d6   :  { %v459_v13 = vpop.permute.xlu2 %458 }
 0x6ee   :  { %v457_v6 = vpop.permute.xlu1 %456 }
 0x6ef   :  { %v461_v7 = vmul.f32 %v457_v6, %v453_v5  ;;  %v455_v8 = vpop.permute.xlu0 %454 }
 0x6f0   :  { %v460_v9 = vmul.f32 %v455_v8, %v415_v43  ;;  %v924_v8 = vld [vmem:[%s1349_s5 + $0x18] sm:$0xff] }
 0x6f1   :  { %661 = vmatpush.bf16.msra.mxu3 %v924_v8 }
 0x6f2   :  { %v462_v10 = vadd.f32 %v461_v7, %v460_v9 }
 0x6f4   :  { %992 = vtanh.f32 %v462_v10 }
 0x6fa   :  { %v993_v11 = vpop.eup %992 }
 0x6fb   :  { %v464_v14 = vmul.f32 %v993_v11, %v459_v13  ;;  %v922_v13 = vld [vmem:[%s1349_s5 + $0x8] sm:$0xff] }
 0x6fd   :  { %v465_v15 = vpack.c.bf16 %v464_v14, %v464_v14 }
 0x6ff   :  { %474 = vmatmul.bf16.vlgmr.msrb.gmra.mxu0 %v465_v15 }
 0x77c   :  { %v475_v17 = vpop.f32.mrf.mxu0 }
 0x77d   :  { %v479_v18 = vadd.f32 %v475_v17, %v111_v16  ;;  %v1018_v17 = vmov 0.0  }
 0x77f   :  { %v842_v19 = vmul.f32 -1.442695, %v479_v18 }
 0x781   :  { %994 = vpow2.f32 %v842_v19 }
 0x784   :  { %v477_v20 = vpop.f32.mrf.mxu0 }
 0x787   :  { %v995_v21 = vpop.eup %994 }
 0x788   :  { %v484_v22 = vadd.f32 1.0, %v995_v21 }
 0x78a   :  { %996 = vrcp.f32 %v484_v22  ;;  %v496_v27 = vand.u32 2147483648, %v484_v22  ;;  %v494_v29 = vand.u32 2147483647, %v484_v22  ;;  %vm490_vm15 = vweird.f32 %v484_v22 }
 0x78b   :  { %998 = vtanh.f32 %v479_v18 }
 0x78c   :  { %v497_v49 = vor.u32 1.1754944e-38, %v496_v27  ;;  %vm495_vm1 = vcmp.eq.f32.partialorder %v494_v29, 8.507059e+37  ;;  %v933_v27 = vld [vmem:[%s1351_s8 + $0x20] sm:$0xff]  ;;  %v931_v29 = vld [vmem:[%s1351_s8 + $0x10] sm:$0xff] }
 0x790   :  { %v997_v23 = vpop.eup %996 }
 0x791   :  { %v486_v25 = vmul.f32 %v997_v23, %v484_v22  ;;  %vm491_vm14 = vweird.f32 %v997_v23  ;;  %v999_v33 = vpop.eup %998  ;;  %v921_v22 = vld [vmem:[%s1349_s5] sm:$0xff] }
 0x792   :  { %vm492_vm0 = vmor %vm490_vm15, %vm491_vm14 }
 0x793   :  { %v487_v26 = vsub.f32 1.0, %v486_v25  ;;  %v935_v25 = vld [vmem:[%s1351_s8 + $0x30] sm:$0xff] }
 0x795   :  { %v488_v28 = vmul.f32 %v997_v23, %v487_v26  ;;  %v934_v26 = vld [vmem:[%s1351_s8 + $0x28] sm:$0xff] }
 0x797   :  { %v489_v30 = vadd.f32 %v997_v23, %v488_v28  ;;  %v932_v28 = vld [vmem:[%s1351_s8 + $0x18] sm:$0xff] }
 0x799   :  { %v493_v32 = vsel %vm492_vm0, %v997_v23, %v489_v30  ;;  %v936_v23 = vld [vmem:[%s1351_s8 + $0x38] sm:$0xff] }
 0x79a   :  { %v498_v34 = vsel %vm495_vm1, %v497_v49, %v493_v32  ;;  %739 = vmatpush.bf16.msra.mxu0 %v936_v23 }
 0x79b   :  { %v500_v47 = vsel %vm1199_vm5, %v999_v33, %v498_v34  ;;  %v930_v33 = vld [vmem:[%s1351_s8 + $0x8] sm:$0xff]  ;;  %v929_v34 = vld [vmem:[%s1351_s8] sm:$0xff] }
 0x79c   :  { %505 = vrot.lane.b32.xlu2 %v500_v47, %s1015_s16  ;;  %503 = vrot.lane.b32.xlu1 %v500_v47, %s1017_s18 }
 0x79d   :  { %501 = vrot.lane.b32.xlu0 %v500_v47, %s1016_s17 }
 0x79e   :  { %740 = vmatpush.bf16.msra.mxu0 %v935_v25 }
 0x7a2   :  { %741 = vmatpush.bf16.msra.mxu0 %v934_v26 }
 0x7a6   :  { %742 = vmatpush.bf16.msra.mxu0 %v933_v27 }
 0x7aa   :  { %743 = vmatpush.bf16.msra.mxu0 %v932_v28 }
 0x7ae   :  { %744 = vmatpush.bf16.msra.mxu0 %v931_v29 }
 0x7b2   :  { %745 = vmatpush.bf16.msra.mxu0 %v930_v33 }
 0x7b6   :  { %746 = vmatpush.bf16.msra.mxu0 %v929_v34 }
 0x7f6   :  { %v506_v41 = vpop.permute.xlu2 %505 }
 0x80e   :  { %v504_v35 = vpop.permute.xlu1 %503 }
 0x80f   :  { %v508_v36 = vmul.f32 %v504_v35, %v500_v47  ;;  %v502_v37 = vpop.permute.xlu0 %501  ;;  %v945_v47 = vld [vmem:[%s1350_s6] ss:$0 sm:$0xff] }
 0x810   :  { %v507_v38 = vmul.f32 %v502_v37, %v462_v10  ;;  %v923_v10 = vld [vmem:[%s1349_s5 + $0x10] sm:$0xff]  ;;  %v671_v37 = vld [vmem:[%s1352_s7] sm:$0xff] }
 0x811   :  { %662 = vmatpush.bf16.msra.mxu3 %v923_v10 }
 0x812   :  { %v509_v39 = vadd.f32 %v508_v36, %v507_v38 }
 0x814   :  { %1000 = vtanh.f32 %v509_v39 }
 0x815   :  { %663 = vmatpush.bf16.msra.mxu3 %v922_v13 }
 0x819   :  { %664 = vmatpush.bf16.msra.mxu3 %v921_v22 }
 0x81a   :  { %v1001_v40 = vpop.eup %1000 }
 0x81b   :  { %v511_v42 = vmul.f32 %v1001_v40, %v506_v41 }
 0x81d   :  { %v512_v43 = vpack.c.bf16 %v511_v42, %v511_v42  ;;  %v690_v42 = vld [vmem:[%s1353_s9] sm:$0xff] }
 0x81f   :  { %521 = vmatmul.bf16.vlgmr.msra.gmra.mxu1 %v512_v43 }
 0x89c   :  { %v522_v45 = vpop.f32.mrf.mxu1 }
 0x89d   :  { %v526_v46 = vadd.f32 %v522_v45, %v113_v44 }
 0x89f   :  { %v843_v51 = vmul.f32 -1.442695, %v526_v46 }
 0x8a1   :  { %1002 = vpow2.f32 %v843_v51 }
 0x8a4   :  { %v524_v52 = vpop.f32.mrf.mxu1 }
 0x8a7   :  { %v1003_v53 = vpop.eup %1002 }
 0x8a8   :  { %v531_v54 = vadd.f32 1.0, %v1003_v53 }
 0x8aa   :  { %1004 = vrcp.f32 %v531_v54  ;;  %v543_v58 = vand.u32 2147483648, %v531_v54  ;;  %v541_v60 = vand.u32 2147483647, %v531_v54  ;;  %vm537_vm3 = vweird.f32 %v531_v54 }
 0x8ab   :  { %1006 = vtanh.f32 %v526_v46 }
 0x8ac   :  { %v544_v12 = vor.u32 1.1754944e-38, %v543_v58  ;;  %vm542_vm6 = vcmp.eq.f32.partialorder %v541_v60, 8.507059e+37 }
 0x8b0   :  { %v1005_v55 = vpop.eup %1004 }
 0x8b1   :  { %v533_v56 = vmul.f32 %v1005_v55, %v531_v54  ;;  %vm538_vm2 = vweird.f32 %v1005_v55  ;;  %v1007_v62 = vpop.eup %1006 }
 0x8b2   :  { %vm539_vm4 = vmor %vm537_vm3, %vm538_vm2 }
 0x8b3   :  { %v534_v57 = vsub.f32 1.0, %v533_v56 }
 0x8b5   :  { %v535_v59 = vmul.f32 %v1005_v55, %v534_v57 }
 0x8b7   :  { %v536_v61 = vadd.f32 %v1005_v55, %v535_v59 }
 0x8b9   :  { %v540_v50 = vsel %vm539_vm4, %v1005_v55, %v536_v61 }
 0x8ba   :  { %v545_v63 = vsel %vm542_vm6, %v544_v12, %v540_v50 }
 0x8bb   :  { %v547_v0 = vsel %vm1199_vm5, %v1007_v62, %v545_v63 }
 0x8bc   :  { %552 = vrot.lane.b32.xlu2 %v547_v0, %s1015_s16  ;;  %550 = vrot.lane.b32.xlu1 %v547_v0, %s1017_s18 }
 0x8bd   :  { %548 = vrot.lane.b32.xlu0 %v547_v0, %s1016_s17 }
 0x8c5   :  { %561 = vperm.xlu0 %943, %v559_v1  }
 0x916   :  { %v553_v15 = vpop.permute.xlu2 %552 }
 0x92e   :  { %v551_v4 = vpop.permute.xlu1 %550 }
 0x92f   :  { %v555_v5 = vmul.f32 %v551_v4, %v547_v0  ;;  %v549_v6 = vpop.permute.xlu0 %548 }
 0x930   :  { %v554_v7 = vmul.f32 %v549_v6, %v509_v39 }
 0x932   :  { %v556_v9 = vadd.f32 %v555_v5, %v554_v7 }
 0x934   :  { %1008 = vtanh.f32 %v556_v9 }
 0x937   :  { %v562_v11 = vpop.permute.xlu0 %561 }
 0x938   :  { %vm563_vm5 = vcmp.eq.s32.totalorder %v1190_v24, %v562_v11 }
 0x939   :  { %v564_v18 = vsel %vm563_vm5, 1.0, %v1018_v17 }
 0x93a   :  { %v1009_v14 = vpop.eup %1008  ;;  %v565_v20 = vpack.c.bf16 %v564_v18, %v564_v18 }
 0x93b   :  { %v558_v16 = vmul.f32 %v1009_v14, %v553_v15 }
 0x93d   :  { %v566_v19 = vpack.c.bf16 %v558_v16, %v558_v16 }
 0x93f   :  { %v573_v21 = vsel %vm571_vm7, %v566_v19, 0 }
 0x940   :  { %582 = vmatpush.bf16.msrb.mxu2 %v573_v21 }
 0x943   :  { %844 = vmatmul.msk.bf16.vlgmr.msrb.gmra.mxu2 %vm567_vm8, %v565_v20 }
 0x9c6   :  { %v584_v30 = vpop.f32.mrf.mxu2 }
 0x9c7   :  { %v588_v49 = vpack.c.bf16 %v584_v30, %v584_v30 }
 0x9c9   :  { %665 = vmatmul.bf16.vlgmr.msra.gmra.mxu3 %v588_v49 }
 0x9ce   :  { %v586_v32 = vpop.f32.mrf.mxu2 }
 0xa4c   :  { %v666_v35 = vpop.f32.mrf.mxu3 }
 0xa4d   :  { %v667_v36 = vadd.f32 %v945_v47, %v666_v35 }
 0xa4f   :  { %v670_v38 = vmax.f32 %v667_v36, 0.0 }
 0xa51   :  { %v672_v39 = vmul.f32 %v671_v37, %v670_v38 }
 0xa53   :  { %v673_v40 = vpack.c.bf16 %v672_v39, %v672_v39 }
 0xa54   :  { %v668_v41 = vpop.f32.mrf.mxu3 }
 0xa55   :  { %747 = vmatmul.bf16.vlgmr.msra.gmra.mxu0 %v673_v40 }
 0xad2   :  { %v748_v43 = vpop.f32.mrf.mxu0 }
 0xad3   :  { %v749_v44 = vadd.f32 %v748_v43, %v690_v42 }
 0xad5   :  { %755 = vmax.xlane.f32.xlu1 %v749_v44 }
 0xada   :  { %v750_v45 = vpop.f32.mrf.mxu0 }
 0xb48   :  { %v756_v46 = vpop.xlane.xlu1 %755 }
 0xb49   :  { %v757_v51 = vsub.f32 %v749_v44, %v756_v46 }
 0xb4b   :  { %v758_v52 = vmul.f32 1.442695, %v757_v51 }
 0xb4d   :  { %1010 = vpow2.f32 %v758_v52 }
 0xb53   :  { %v1011_v54 = vpop.eup %1010 }
 0xb54   :  { %v760_v55 = vsel %vm1333_vm11, %v1011_v54, 0.0 }
 0xb55   :  { %761 = vadd.xlane.f32.xlu2 %v760_v55 }
 0xbc8   :  { %v762_v56 = vpop.xlane.xlu2 %761 }
 0xbc9   :  { %1012 = vrcp.f32 %v762_v56  ;;  %v774_v60 = vand.u32 2147483648, %v762_v56  ;;  %v772_v12 = vand.u32 2147483647, %v762_v56  ;;  %vm768_vm13 = vweird.f32 %v762_v56 }
 0xbcb   :  { %v775_v24 = vor.u32 1.1754944e-38, %v774_v60  ;;  %vm773_vm15 = vcmp.eq.f32.partialorder %v772_v12, 8.507059e+37 }
 0xbcf   :  { %v1013_v57 = vpop.eup %1012 }
 0xbd0   :  { %v764_v58 = vmul.f32 %v1013_v57, %v762_v56  ;;  %vm769_vm12 = vweird.f32 %v1013_v57 }
 0xbd1   :  { %vm770_vm14 = vmor %vm768_vm13, %vm769_vm12 }
 0xbd2   :  { %v765_v59 = vsub.f32 1.0, %v764_v58 }
 0xbd4   :  { %v766_v61 = vmul.f32 %v1013_v57, %v765_v59 }
 0xbd6   :  { %v767_v50 = vadd.f32 %v1013_v57, %v766_v61 }
 0xbd8   :  { %v771_v62 = vsel %vm770_vm14, %v1013_v57, %v767_v50 }
 0xbd9   :  { %v776_v63 = vsel %vm773_vm15, %v775_v24, %v771_v62 }
 0xbda   :  { %v777_v0 = vmul.f32 %v1011_v54, %v776_v63 }
 0xbdc   :  { %v778_v1 = vsel %vm1333_vm11, %v777_v0, %v749_v44 }
 0xbdd   :  { %779 = vst [vmem:[%s1354_s10] sm:$0xff] %v778_v1 }

</bundles_post_ra>
